<compile_context>
chip_gen: v7x
topology: tpu7x:2x2x1
jax: 0.10.0
libtpu: 0.0.40
codegen_flags: <defaults>
</compile_context>

<pallas_src>
import jax
import jax.numpy as jnp
from jax.experimental import pallas as pl
from jax.experimental.pallas import tpu as pltpu

_BN_EPS = 1e-5
_LANE = 128          # lane granularity (use 256-multiples on v6e/v7x at scale)
_SUBLANE_BF16 = 16   # bf16 LHS min sublane tile for the MXU


def _round_up(x, m):
    return (x + m - 1) // m * m


# -----------------------------------------------------------------------------
# Fused whole-network kernel (single block, everything resident in VMEM).
# -----------------------------------------------------------------------------
def _make_fused_kernel(n_expand, batch, b_pad):
    """x -> Linear+ReLU -> [Linear(no bias)+BN(train)+ReLU]*n_expand -> row-dot."""
    inv_n = 1.0 / float(batch)            # BN uses the real (unpadded) batch size
    need_row_mask = (b_pad != batch)

    def kernel(*refs):
        # refs layout: x, (w_0, vec_0), (w_1, vec_1), ..., head, out
        x_ref = refs[0]
        o_ref = refs[-1]
        head_ref = refs[-2]
        layer_refs = refs[1:-2]

        if need_row_mask:
            row_ids = jax.lax.broadcasted_iota(jnp.int32, (b_pad, 1), 0)
            row_mask = (row_ids < batch).astype(jnp.float32)

        # ---- layer 0: Linear + ReLU (no BN). x is already bf16, padded rows 0.
        w0 = layer_refs[0]                                      # (in_pad0, p0) bf16
        v0 = layer_refs[1]                                      # (8, p0) f32, row0=bias
        y = jnp.dot(x_ref[...], w0[...],
                    preferred_element_type=jnp.float32)         # bf16 MXU, f32 acc
        h = jnp.maximum(y + v0[0:1, :], 0.0)
        if need_row_mask:
            h = h * row_mask          # re-zero padded rows (bias leaked into them)

        # ---- expand layers: Linear (bias dropped) + BatchNorm(train) + ReLU --
        for l in range(n_expand):
            w = layer_refs[2 + 2 * l]                           # (p_prev, p_l) bf16
            v = layer_refs[3 + 2 * l]                           # (8, p_l): gamma, beta
            y = jnp.dot(h.astype(jnp.bfloat16), w[...],
                        preferred_element_type=jnp.float32)
            # Padded rows of h are zero -> padded rows of y are zero, so the
            # one-pass stats (biased variance, like torch BN train) are exact
            # over the real batch.
            mean = jnp.sum(y, axis=0, keepdims=True) * inv_n
            mean_sq = jnp.sum(y * y, axis=0, keepdims=True) * inv_n
            var = mean_sq - mean * mean
            scale = v[0:1, :] * jax.lax.rsqrt(var + _BN_EPS)    # gamma * rsqrt (EUP)
            shift = v[1:2, :] - mean * scale                    # beta - mean*scale
            h = jnp.maximum(y * scale + shift, 0.0)             # folded BN epilogue
            if need_row_mask:
                h = h * row_mask      # re-zero padded rows (shift leaked into them)

        # ---- final head: Linear(prev, 1) as a VPU/XLU row-dot ----------------
        head = head_ref[...]                                    # (8, p_last) f32
        hw = head[0:1, :]                                       # padded weight row
        hb = head[1:2, 0:1]                                     # scalar bias
        res = jnp.sum(h * hw, axis=1, keepdims=True) + hb       # (b_pad, 1)
        # Single lane-dense vreg store; wrapper slices [:batch, :1].
        o_ref[...] = jnp.broadcast_to(res, (b_pad, _LANE))

    return kernel


_VMEM_SPEC = pl.BlockSpec(memory_space=pltpu.MemorySpace.VMEM)


def linear_net_forward(packed, x):
    """Single fused pallas_call for the whole LinearNet forward."""
    batch, in_f = x.shape
    in_pad0 = packed["in_pad0"]
    n_expand = packed["n_expand"]
    b_pad = _round_up(batch, _SUBLANE_BF16)   # bf16 LHS sublane tile

    # Layout plumbing only: zero-pad to the tile AND pre-cast to bf16 (halves
    # input DMA bytes, removes the in-kernel cast for layer 0).
    x_pad = jnp.pad(x, ((0, b_pad - batch), (0, in_pad0 - in_f))).astype(jnp.bfloat16)

    operands = [x_pad]
    for (w, v) in packed["layers"]:
        operands += [w, v]
    operands.append(packed["head"])

    kernel = _make_fused_kernel(n_expand, batch, b_pad)
    out = pl.pallas_call(
        kernel,
        out_shape=jax.ShapeDtypeStruct((b_pad, _LANE), jnp.float32),
        in_specs=[_VMEM_SPEC] * len(operands),
        out_specs=_VMEM_SPEC,
    )(*operands)
    return out[:batch, :1]


# -----------------------------------------------------------------------------
# Parameter construction (deterministic, synthetic) + one-time kernel packing.
# -----------------------------------------------------------------------------
def init_linear_net_params(key, input_features, starting_features, expand_ratio, n_expand):
    """Params in PyTorch convention (out, in), mirroring LinearNet.__init__."""
    params = {"expand": []}
    k = key

    def _linear_params(k, in_f, out_f):
        k, kw, kb = jax.random.split(k, 3)
        bound = 1.0 / jnp.sqrt(jnp.float32(in_f))
        w = jax.random.uniform(kw, (out_f, in_f), jnp.float32, -bound, bound)
        b = jax.random.uniform(kb, (out_f,), jnp.float32, -bound, bound)
        return k, w, b

    k, w0, b0 = _linear_params(k, input_features, starting_features)
    params["first"] = (w0, b0)

    prev = starting_features
    for _ in range(n_expand):
        nxt = int(prev * expand_ratio)
        k, w, b = _linear_params(k, prev, nxt)
        gamma = jnp.ones((nxt,), jnp.float32)
        beta = jnp.zeros((nxt,), jnp.float32)
        params["expand"].append((w, b, gamma, beta))
        prev = nxt

    k, wf, bf = _linear_params(k, prev, 1)
    params["final"] = (wf, bf)
    return params


def pack_params_for_kernel(params):
    """One-time prep (outside the hot path): pre-transpose to (in, out),
    zero-pad each layer to its OWN (in_pad, out_pad) multiples of 128, cast
    weights to bf16, and pack the small per-feature vectors into (8, out_pad)
    f32 slabs. Bias is dropped for the BN layers (cancelled by BN)."""
    w0, b0 = params["first"]
    wf, bf = params["final"]
    n_expand = len(params["expand"])

    layers = []

    # layer 0: Linear + ReLU (keeps its bias)
    out_f, in_f = w0.shape
    in_pad0 = _round_up(in_f, _LANE)
    out_pad = _round_up(out_f, _LANE)
    wl = jnp.zeros((in_pad0, out_pad), jnp.float32).at[:in_f, :out_f].set(w0.T)
    vl = jnp.zeros((8, out_pad), jnp.float32).at[0, :out_f].set(b0)     # row 0 = bias
    layers.append((wl.astype(jnp.bfloat16), vl))
    prev_pad = out_pad

    # expand layers: Linear (bias dropped) + BN + ReLU
    for (w, b, gamma, beta) in params["expand"]:
        out_f, in_f = w.shape
        out_pad = _round_up(out_f, _LANE)
        wl = jnp.zeros((prev_pad, out_pad), jnp.float32).at[:in_f, :out_f].set(w.T)
        vl = jnp.zeros((8, out_pad), jnp.float32)
        vl = vl.at[0, :out_f].set(gamma).at[1, :out_f].set(beta)        # no bias row
        layers.append((wl.astype(jnp.bfloat16), vl))
        prev_pad = out_pad

    head = jnp.zeros((8, prev_pad), jnp.float32)
    head = head.at[0, : wf.shape[1]].set(wf[0]).at[1, 0].set(bf[0])

    return {
        "layers": layers,        # list of (bf16 weight, f32 vec) per layer
        "head": head,            # f32 head weight row + scalar bias
        "in_pad0": in_pad0,
        "n_expand": n_expand,
    }


# -----------------------------------------------------------------------------
# References for correctness checking.
# -----------------------------------------------------------------------------
def linear_net_forward_ref_f32(params, x):
    """Pure-f32 PyTorch-semantics reference (biases kept, two-pass BN stats)."""
    w0, b0 = params["first"]
    h = jnp.maximum(x @ w0.T + b0, 0.0)
    for (w, b, gamma, beta) in params["expand"]:
        y = h @ w.T + b
        mean = jnp.mean(y, axis=0, keepdims=True)
        var = jnp.mean((y - mean) ** 2, axis=0, keepdims=True)
        y = (y - mean) * jax.lax.rsqrt(var + _BN_EPS) * gamma + beta
        h = jnp.maximum(y, 0.0)
    wf, bf = params["final"]
    return h @ wf.T + bf


def linear_net_forward_ref_kernel_numerics(params, x):
    """Mirrors the kernel's numerics exactly: bf16 MXU operands with f32
    accumulation, bias dropped in BN layers, one-pass stats, folded BN
    scale/shift, VPU row-dot head."""
    inv_n = 1.0 / float(x.shape[0])

    def mm(a, w):
        return jnp.dot(a.astype(jnp.bfloat16), w.T.astype(jnp.bfloat16),
                       preferred_element_type=jnp.float32)

    w0, b0 = params["first"]
    h = jnp.maximum(mm(x, w0) + b0, 0.0)
    for (w, b, gamma, beta) in params["expand"]:
        y = mm(h, w)                                  # bias cancelled by BN
        mean = jnp.sum(y, axis=0, keepdims=True) * inv_n
        mean_sq = jnp.sum(y * y, axis=0, keepdims=True) * inv_n
        var = mean_sq - mean * mean
        scale = gamma * jax.lax.rsqrt(var + _BN_EPS)
        shift = beta - mean * scale
        h = jnp.maximum(y * scale + shift, 0.0)
    wf, bf = params["final"]
    return jnp.sum(h * wf[0], axis=1, keepdims=True) + bf


if __name__ == "__main__":
    # Small, forward-consistent shapes.
    batch = 8
    input_features = 16
    starting_features = 32
    expand_ratio = 2
    n_expand = 2   # hidden widths: 16 -> 32 -> 64 -> 128 -> 1

    key = jax.random.PRNGKey(0)
    key, kx = jax.random.split(key)
    x = jax.random.normal(kx, (batch, input_features), jnp.float32)

    params = init_linear_net_params(
        key, input_features, starting_features, expand_ratio, n_expand
    )
    packed = pack_params_for_kernel(params)

    out = jax.block_until_ready(linear_net_forward(packed, x))

    ref_exact = linear_net_forward_ref_kernel_numerics(params, x)
    ref_f32 = linear_net_forward_ref_f32(params, x)

    assert out.shape == (batch, 1), out.shape
    # Hard check vs. a reference with identical numerics (bf16 MXU, f32 epilogue).
    assert jnp.allclose(out, ref_exact, atol=1e-3, rtol=1e-3), (out, ref_exact)
    # Semantic check vs. the pure-f32 PyTorch-mode reference (bf16 matmul tolerance).
    assert jnp.allclose(out, ref_f32, atol=5e-2, rtol=5e-2), (out, ref_f32)

    print("KERNEL_OK")
</pallas_src>

<mosaic_0001>
module attributes {stable_mosaic.version = 11 : i64} {
  func.func @kernel(%arg0: memref<16x128xbf16, #tpu.memory_space<vmem>>, %arg1: memref<128x128xbf16, #tpu.memory_space<vmem>>, %arg2: memref<8x128xf32, #tpu.memory_space<vmem>>, %arg3: memref<128x128xbf16, #tpu.memory_space<vmem>>, %arg4: memref<8x128xf32, #tpu.memory_space<vmem>>, %arg5: memref<128x128xbf16, #tpu.memory_space<vmem>>, %arg6: memref<8x128xf32, #tpu.memory_space<vmem>>, %arg7: memref<8x128xf32, #tpu.memory_space<vmem>>, %arg8: memref<16x128xf32, #tpu.memory_space<vmem>>) attributes {dimension_semantics = [], scalar_prefetch = 0 : i64, scratch_operands = 0 : i64, tpu.core_type = #tpu.core_type<tc>} {
    %0 = tpu.iota {dimensions = array<i32: 0>} : vector<16x1xi32>
    %c8_i32 = arith.constant 8 : i32
    %1 = vector.broadcast %c8_i32 : i32 to vector<16x1xi32>
    %2 = arith.cmpi slt, %0, %1 : vector<16x1xi32>
    %3 = arith.extui %2 : vector<16x1xi1> to vector<16x1xi32>
    %4 = arith.sitofp %3 : vector<16x1xi32> to vector<16x1xf32>
    %c0 = arith.constant 0 : index
    %c0_0 = arith.constant 0 : index
    %5 = vector.load %arg0[%c0, %c0_0] : memref<16x128xbf16, #tpu.memory_space<vmem>>, vector<16x128xbf16>
    %c0_1 = arith.constant 0 : index
    %c0_2 = arith.constant 0 : index
    %6 = vector.load %arg1[%c0_1, %c0_2] : memref<128x128xbf16, #tpu.memory_space<vmem>>, vector<128x128xbf16>
    %cst = arith.constant dense<0.000000e+00> : vector<16x128xf32>
    %7 = tpu.matmul %5, %6, %cst {dimension_numbers = #tpu.dot_dimension_numbers<[1], [0], [0], [1], [0, 0, 1, 1], [], []>} : vector<16x128xbf16>, vector<128x128xbf16>, vector<16x128xf32> -> vector<16x128xf32>
    %c0_3 = arith.constant 0 : index
    %c0_4 = arith.constant 0 : index
    %8 = vector.load %arg2[%c0_3, %c0_4] : memref<8x128xf32, #tpu.memory_space<vmem>>, vector<1x128xf32>
    %9 = vector.broadcast %8 : vector<1x128xf32> to vector<16x128xf32>
    %10 = arith.addf %7, %9 : vector<16x128xf32>
    %cst_5 = arith.constant 0.000000e+00 : f32
    %11 = vector.broadcast %cst_5 : f32 to vector<16x128xf32>
    %12 = arith.maximumf %10, %11 : vector<16x128xf32>
    %13 = vector.broadcast %4 : vector<16x1xf32> to vector<16x128xf32>
    %14 = arith.mulf %12, %13 : vector<16x128xf32>
    %15 = arith.truncf %14 : vector<16x128xf32> to vector<16x128xbf16>
    %c0_6 = arith.constant 0 : index
    %c0_7 = arith.constant 0 : index
    %16 = vector.load %arg3[%c0_6, %c0_7] : memref<128x128xbf16, #tpu.memory_space<vmem>>, vector<128x128xbf16>
    %cst_8 = arith.constant dense<0.000000e+00> : vector<16x128xf32>
    %17 = tpu.matmul %15, %16, %cst_8 {dimension_numbers = #tpu.dot_dimension_numbers<[1], [0], [0], [1], [0, 0, 1, 1], [], []>} : vector<16x128xbf16>, vector<128x128xbf16>, vector<16x128xf32> -> vector<16x128xf32>
    %cst_9 = arith.constant dense<0.000000e+00> : vector<128xf32>
    %18 = vector.multi_reduction <add>, %17, %cst_9 [0] : vector<16x128xf32> to vector<128xf32>
    %19 = vector.shape_cast %18 : vector<128xf32> to vector<1x128xf32>
    %cst_10 = arith.constant 1.250000e-01 : f32
    %20 = vector.broadcast %cst_10 : f32 to vector<1x128xf32>
    %21 = arith.mulf %19, %20 : vector<1x128xf32>
    %22 = arith.mulf %17, %17 : vector<16x128xf32>
    %cst_11 = arith.constant dense<0.000000e+00> : vector<128xf32>
    %23 = vector.multi_reduction <add>, %22, %cst_11 [0] : vector<16x128xf32> to vector<128xf32>
    %24 = vector.shape_cast %23 : vector<128xf32> to vector<1x128xf32>
    %cst_12 = arith.constant 1.250000e-01 : f32
    %25 = vector.broadcast %cst_12 : f32 to vector<1x128xf32>
    %26 = arith.mulf %24, %25 : vector<1x128xf32>
    %27 = arith.mulf %21, %21 : vector<1x128xf32>
    %28 = arith.subf %26, %27 : vector<1x128xf32>
    %c0_13 = arith.constant 0 : index
    %c0_14 = arith.constant 0 : index
    %29 = vector.load %arg4[%c0_13, %c0_14] : memref<8x128xf32, #tpu.memory_space<vmem>>, vector<1x128xf32>
    %cst_15 = arith.constant 9.99999974E-6 : f32
    %30 = vector.broadcast %cst_15 : f32 to vector<1x128xf32>
    %31 = arith.addf %28, %30 : vector<1x128xf32>
    %32 = math.rsqrt %31 : vector<1x128xf32>
    %33 = arith.mulf %29, %32 : vector<1x128xf32>
    %c1 = arith.constant 1 : index
    %c0_16 = arith.constant 0 : index
    %34 = vector.load %arg4[%c1, %c0_16] : memref<8x128xf32, #tpu.memory_space<vmem>>, vector<1x128xf32>
    %35 = arith.mulf %21, %33 : vector<1x128xf32>
    %36 = arith.subf %34, %35 : vector<1x128xf32>
    %37 = vector.broadcast %33 : vector<1x128xf32> to vector<16x128xf32>
    %38 = arith.mulf %17, %37 : vector<16x128xf32>
    %39 = vector.broadcast %36 : vector<1x128xf32> to vector<16x128xf32>
    %40 = arith.addf %38, %39 : vector<16x128xf32>
    %cst_17 = arith.constant 0.000000e+00 : f32
    %41 = vector.broadcast %cst_17 : f32 to vector<16x128xf32>
    %42 = arith.maximumf %40, %41 : vector<16x128xf32>
    %43 = vector.broadcast %4 : vector<16x1xf32> to vector<16x128xf32>
    %44 = arith.mulf %42, %43 : vector<16x128xf32>
    %45 = arith.truncf %44 : vector<16x128xf32> to vector<16x128xbf16>
    %c0_18 = arith.constant 0 : index
    %c0_19 = arith.constant 0 : index
    %46 = vector.load %arg5[%c0_18, %c0_19] : memref<128x128xbf16, #tpu.memory_space<vmem>>, vector<128x128xbf16>
    %cst_20 = arith.constant dense<0.000000e+00> : vector<16x128xf32>
    %47 = tpu.matmul %45, %46, %cst_20 {dimension_numbers = #tpu.dot_dimension_numbers<[1], [0], [0], [1], [0, 0, 1, 1], [], []>} : vector<16x128xbf16>, vector<128x128xbf16>, vector<16x128xf32> -> vector<16x128xf32>
    %cst_21 = arith.constant dense<0.000000e+00> : vector<128xf32>
    %48 = vector.multi_reduction <add>, %47, %cst_21 [0] : vector<16x128xf32> to vector<128xf32>
    %49 = vector.shape_cast %48 : vector<128xf32> to vector<1x128xf32>
    %cst_22 = arith.constant 1.250000e-01 : f32
    %50 = vector.broadcast %cst_22 : f32 to vector<1x128xf32>
    %51 = arith.mulf %49, %50 : vector<1x128xf32>
    %52 = arith.mulf %47, %47 : vector<16x128xf32>
    %cst_23 = arith.constant dense<0.000000e+00> : vector<128xf32>
    %53 = vector.multi_reduction <add>, %52, %cst_23 [0] : vector<16x128xf32> to vector<128xf32>
    %54 = vector.shape_cast %53 : vector<128xf32> to vector<1x128xf32>
    %cst_24 = arith.constant 1.250000e-01 : f32
    %55 = vector.broadcast %cst_24 : f32 to vector<1x128xf32>
    %56 = arith.mulf %54, %55 : vector<1x128xf32>
    %57 = arith.mulf %51, %51 : vector<1x128xf32>
    %58 = arith.subf %56, %57 : vector<1x128xf32>
    %c0_25 = arith.constant 0 : index
    %c0_26 = arith.constant 0 : index
    %59 = vector.load %arg6[%c0_25, %c0_26] : memref<8x128xf32, #tpu.memory_space<vmem>>, vector<1x128xf32>
    %cst_27 = arith.constant 9.99999974E-6 : f32
    %60 = vector.broadcast %cst_27 : f32 to vector<1x128xf32>
    %61 = arith.addf %58, %60 : vector<1x128xf32>
    %62 = math.rsqrt %61 : vector<1x128xf32>
    %63 = arith.mulf %59, %62 : vector<1x128xf32>
    %c1_28 = arith.constant 1 : index
    %c0_29 = arith.constant 0 : index
    %64 = vector.load %arg6[%c1_28, %c0_29] : memref<8x128xf32, #tpu.memory_space<vmem>>, vector<1x128xf32>
    %65 = arith.mulf %51, %63 : vector<1x128xf32>
    %66 = arith.subf %64, %65 : vector<1x128xf32>
    %67 = vector.broadcast %63 : vector<1x128xf32> to vector<16x128xf32>
    %68 = arith.mulf %47, %67 : vector<16x128xf32>
    %69 = vector.broadcast %66 : vector<1x128xf32> to vector<16x128xf32>
    %70 = arith.addf %68, %69 : vector<16x128xf32>
    %cst_30 = arith.constant 0.000000e+00 : f32
    %71 = vector.broadcast %cst_30 : f32 to vector<16x128xf32>
    %72 = arith.maximumf %70, %71 : vector<16x128xf32>
    %73 = vector.broadcast %4 : vector<16x1xf32> to vector<16x128xf32>
    %74 = arith.mulf %72, %73 : vector<16x128xf32>
    %c0_31 = arith.constant 0 : index
    %c0_32 = arith.constant 0 : index
    %75 = vector.load %arg7[%c0_31, %c0_32] : memref<8x128xf32, #tpu.memory_space<vmem>>, vector<8x128xf32>
    %76 = vector.extract_strided_slice %75 {offsets = [0, 0], sizes = [1, 128], strides = [1, 1]} : vector<8x128xf32> to vector<1x128xf32>
    %77 = vector.extract_strided_slice %75 {offsets = [1, 0], sizes = [1, 1], strides = [1, 1]} : vector<8x128xf32> to vector<1x1xf32>
    %78 = vector.broadcast %76 : vector<1x128xf32> to vector<16x128xf32>
    %79 = arith.mulf %74, %78 : vector<16x128xf32>
    %cst_33 = arith.constant dense<0.000000e+00> : vector<16xf32>
    %80 = vector.multi_reduction <add>, %79, %cst_33 [1] : vector<16x128xf32> to vector<16xf32>
    %81 = vector.shape_cast %80 : vector<16xf32> to vector<16x1xf32>
    %82 = vector.broadcast %77 : vector<1x1xf32> to vector<16x1xf32>
    %83 = arith.addf %81, %82 : vector<16x1xf32>
    %84 = vector.shape_cast %83 : vector<16x1xf32> to vector<16x1xf32>
    %85 = vector.broadcast %84 : vector<16x1xf32> to vector<16x128xf32>
    %c0_34 = arith.constant 0 : index
    %c0_35 = arith.constant 0 : index
    %86 = vector.load %arg8[%c0_34, %c0_35] : memref<16x128xf32, #tpu.memory_space<vmem>>, vector<16x128xf32>
    tpu.vector_store %arg8[%c0_34, %c0_35], %85 {strides = array<i32>} : memref<16x128xf32, #tpu.memory_space<vmem>>, vector<16x128xf32>,
    return
  }
}

</mosaic_0001>

<bundles_post_ra>
// kernel: tpu_custom_call.1
= control target key start
LH: loop header
LB: loop body
LE: loop exit
PB: predicated region body
PF: predicated region fallthrough
CT: control target
= control target key end

     0   :  { %13 = vsyncpa [#allocation3], 0  ;;  %s1069_s0 = inlined_call_operand.hbm [shape: bf16[16,128], index: 0, kind: input, shape index: {}]   ;;  %s1070_s1 = inlined_call_operand.hbm [shape: bf16[128,128], index: 1, kind: input, shape index: {}]   ;;  %s1071_s2 = inlined_call_operand.hbm [shape: f32[8,128], index: 2, kind: input, shape index: {}]   ;;  %s1072_s3 = inlined_call_operand.hbm [shape: bf16[128,128], index: 3, kind: input, shape index: {}]   ;;  %s1073_s4 = inlined_call_operand.vmem [shape: f32[8,128], index: 4, kind: input, shape index: {}]   ;;  %s1074_s5 = inlined_call_operand.hbm [shape: bf16[128,128], index: 5, kind: input, shape index: {}]   ;;  %s1075_s6 = inlined_call_operand.vmem [shape: f32[8,128], index: 6, kind: input, shape index: {}]   ;;  %s1076_s7 = inlined_call_operand.vmem [shape: f32[8,128], index: 7, kind: input, shape index: {}]   ;;  %s1077_s8 = inlined_call_operand.hbm [shape: f32[16,128], index: 8, kind: output, shape index: {}]  }
   0x1   :  { %14 = vsyncpa [#allocation6], 0 }
   0x2   :  { %15 = vsyncpa [#allocation9], 0 }
   0x3   :  { %16 = vsyncpa [#allocation4], 0  ;;  %s871_s27 = smov [#allocation5]   ;;  %s872_s29 = smov [#allocation8]  }
   0x4   :  { %s34_s28 = sshll.u32 %s871_s27, 4  ;;  %s56_s30 = sshll.u32 %s872_s29, 4  ;;  %s35_s28 = int_to_ptr.vmem [resolvable:$true] %s34_s28  ;;  %s929_s30 = int_to_ptr.vmem [resolvable:$true] %s56_s30 }
   0x5   :  { %s731_s11 = scalar_lea.hbm %s1070_s1, 1024 }
   0x6   :  { %p732_p0 = scmp.ne.s32.totalorder %s1070_s1, %s731_s11  ;;  %p735_p1 = scmp.lt.u32.totalorder %s731_s11, %s1070_s1 }
   0x8   :  { %p737_p2 = pnand %p735_p1, %p732_p0 }
   0xa   :  { %740 = shalt.err (!%p737_p2)
}
   0xb   :  { %s741_s16 = scalar_lea.vmem %s35_s28, 1024  ;;  %p746_p4 = scmp.lt.s32.totalorder %s35_s28, %s35_s28 }
   0xc   :  { %p742_p3 = scmp.ne.s32.totalorder %s35_s28, %s741_s16  ;;  %p747_p5 = scmp.lt.s32.totalorder %s741_s16, %s741_s16 }
   0xe   :  { %p748_p6 = por %p747_p5, %p746_p4 }
  0x10   :  { %p749_p7 = pnand %p748_p6, %p742_p3 }
  0x12   :  { %752 = shalt.err (!%p749_p7)
}
  0x13   :  { %s873_s17 = smov 64   ;;  %s874_s18 = smov 4  }
  0x14   :  { %40 = dma.hbm_to_vmem [thread:$0]  %s1070_s1, 1024, %s35_s28, [#allocation6], %s873_s17, %s873_s17, %s874_s18  }
  0x15   :  { %s753_s23 = scalar_lea.hbm %s1072_s3, 1024 }
  0x16   :  { %p754_p8 = scmp.ne.s32.totalorder %s1072_s3, %s753_s23  ;;  %p757_p9 = scmp.lt.u32.totalorder %s753_s23, %s1072_s3 }
  0x18   :  { %p759_p10 = pnand %p757_p9, %p754_p8 }
  0x1a   :  { %762 = shalt.err (!%p759_p10)
}
  0x1b   :  { %s763_s29 = scalar_lea.vmem %s929_s30, 1024  ;;  %p768_p12 = scmp.lt.s32.totalorder %s929_s30, %s929_s30 }
  0x1c   :  { %p764_p11 = scmp.ne.s32.totalorder %s929_s30, %s763_s29  ;;  %p769_p13 = scmp.lt.s32.totalorder %s763_s29, %s763_s29 }
  0x1e   :  { %p770_p0 = por %p769_p13, %p768_p12 }
  0x20   :  { %p771_p1 = pnand %p770_p0, %p764_p11 }
  0x22   :  { %774 = shalt.err (!%p771_p1)
}
  0x23   :  { %62 = dma.hbm_to_vmem [thread:$0]  %s1072_s3, 1024, %s929_s30, [#allocation9], %s873_s17, %s873_s17, %s874_s18  }
  0x24   :  { %s875_s9 = smov [#allocation2]   ;;  %s876_s11 = smov [#allocation7]  }
  0x25   :  { %s22_s10 = sshll.u32 %s875_s9, 4  ;;  %s47_s12 = sshll.u32 %s876_s11, 4  ;;  %s23_s10 = int_to_ptr.vmem [resolvable:$true] %s22_s10  ;;  %s48_s12 = int_to_ptr.vmem [resolvable:$true] %s47_s12 }
  0x26   :  { %s775_s15 = scalar_lea.hbm %s1069_s0, 128 }
  0x27   :  { %p776_p2 = scmp.ne.s32.totalorder %s1069_s0, %s775_s15  ;;  %p779_p3 = scmp.lt.u32.totalorder %s775_s15, %s1069_s0 }
  0x29   :  { %p781_p4 = pnand %p779_p3, %p776_p2 }
  0x2b   :  { %784 = shalt.err (!%p781_p4)
}
  0x2c   :  { %s785_s3 = scalar_lea.vmem %s23_s10, 128  ;;  %p790_p6 = scmp.lt.s32.totalorder %s23_s10, %s23_s10 }
  0x2d   :  { %p786_p5 = scmp.ne.s32.totalorder %s23_s10, %s785_s3  ;;  %p791_p7 = scmp.lt.s32.totalorder %s785_s3, %s785_s3 }
  0x2f   :  { %p792_p8 = por %p791_p7, %p790_p6 }
  0x31   :  { %p793_p9 = pnand %p792_p8, %p786_p5 }
  0x33   :  { %796 = shalt.err (!%p793_p9)
}
  0x34   :  { %28 = dma.hbm_to_vmem [thread:$0]  %s1069_s0, 128, %s23_s10, [#allocation3], %s873_s17, %s873_s17, %s874_s18  }
  0x35   :  { %s797_s25 = scalar_lea.hbm %s1071_s2, 128 }
  0x36   :  { %p798_p10 = scmp.ne.s32.totalorder %s1071_s2, %s797_s25  ;;  %p801_p11 = scmp.lt.u32.totalorder %s797_s25, %s1071_s2 }
  0x38   :  { %p803_p12 = pnand %p801_p11, %p798_p10 }
  0x3a   :  { %806 = shalt.err (!%p803_p12)
}
  0x3b   :  { %s807_s28 = scalar_lea.vmem %s48_s12, 128  ;;  %p812_p0 = scmp.lt.s32.totalorder %s48_s12, %s48_s12 }
  0x3c   :  { %p808_p13 = scmp.ne.s32.totalorder %s48_s12, %s807_s28  ;;  %p813_p1 = scmp.lt.s32.totalorder %s807_s28, %s807_s28 }
  0x3e   :  { %p814_p2 = por %p813_p1, %p812_p0 }
  0x40   :  { %p815_p3 = pnand %p814_p2, %p808_p13 }
  0x42   :  { %818 = shalt.err (!%p815_p3)
}
  0x43   :  { %50 = dma.hbm_to_vmem [thread:$0]  %s1071_s2, 128, %s48_s12, [#allocation6]  }
  0x44   :  { %s877_s10 = smov [#allocation10]   ;;  %s819_s15 = scalar_lea.hbm %s1074_s5, 1024 }
  0x45   :  { %s70_s11 = sshll.u32 %s877_s10, 4  ;;  %p820_p4 = scmp.ne.s32.totalorder %s1074_s5, %s819_s15  ;;  %s71_s11 = int_to_ptr.vmem [resolvable:$true] %s70_s11 }
  0x46   :  { %p823_p5 = scmp.lt.u32.totalorder %s819_s15, %s1074_s5 }
  0x48   :  { %p825_p6 = pnand %p823_p5, %p820_p4 }
  0x4a   :  { %828 = shalt.err (!%p825_p6)
}
  0x4b   :  { %s829_s3 = scalar_lea.vmem %s71_s11, 1024  ;;  %p834_p8 = scmp.lt.s32.totalorder %s71_s11, %s71_s11 }
  0x4c   :  { %p830_p7 = scmp.ne.s32.totalorder %s71_s11, %s829_s3  ;;  %p835_p9 = scmp.lt.s32.totalorder %s829_s3, %s829_s3 }
  0x4e   :  { %p836_p10 = por %p835_p9, %p834_p8 }
  0x50   :  { %p837_p11 = pnand %p836_p10, %p830_p7 }
  0x52   :  { %840 = shalt.err (!%p837_p11)
}
  0x53   :  { %76 = dma.hbm_to_vmem [thread:$0]  %s1074_s5, 1024, %s71_s11, [#allocation9], %s873_s17, %s873_s17, %s874_s18  }
  0x54   :  { %863 = dma.done.wait [#allocation3], 128  }
  0x55   :  { %864 = vsyncadd [#allocation3], 4294967168 }
  0x56   :  { %865 = dma.done.wait [#allocation6], 1152  }
  0x57   :  { %866 = vsyncadd [#allocation6], 4294966144 }
  0x58   :  { %867 = dma.done.wait [#allocation9], 2048  }
  0x59   :  { %868 = vsyncadd [#allocation9], 4294965248  ;;  %v878_v0 = vmov 0.0   ;;  %vm879_vm0 = vmmov 0   ;;  %v702_v1 = vld [vmem:[#allocation5] sm:$0xff]   ;;  %v703_v2 = vld [vmem:[#allocation5 + $0x8] sm:$0xff]   ;;  %v361_v62 = vlaneseq }
  0x5a   :  { %627 = vmatprep.subr.bf16.mxu0 %v878_v0  ;;  %643 = vmatprep.mubr.msk.bf16.mxu0 %vm879_vm0, %v878_v0  ;;  %v704_v3 = vld [vmem:[#allocation5 + $0x10] sm:$0xff]   ;;  %v711_v4 = vld [vmem:[#allocation8] sm:$0xff]   ;;  %v705_v5 = vld [vmem:[#allocation5 + $0x18] sm:$0xff]  }
  0x5b   :  { %647 = vmatprep.subr.bf16.mxu1 %v878_v0  ;;  %663 = vmatprep.mubr.msk.bf16.mxu1 %vm879_vm0, %v878_v0  ;;  %v712_v6 = vld [vmem:[#allocation8 + $0x8] sm:$0xff]   ;;  %v706_v7 = vld [vmem:[#allocation5 + $0x20] sm:$0xff]   ;;  %v713_v8 = vld [vmem:[#allocation8 + $0x10] sm:$0xff]   ;;  %v1038_v63 = vshrl.u32 %v361_v62, 7 }
  0x5c   :  { %628 = vmatpush3.bf16.msra.mxu0 %v702_v1  ;;  %648 = vmatpush3.bf16.msra.mxu1 %v711_v4  ;;  %v707_v9 = vld [vmem:[#allocation5 + $0x28] sm:$0xff]   ;;  %v714_v10 = vld [vmem:[#allocation8 + $0x18] sm:$0xff]   ;;  %v708_v11 = vld [vmem:[#allocation5 + $0x30] sm:$0xff]  }
  0x5d   :  { %629 = vmatprep.subr.bf16.mxu0 %v878_v0  ;;  %649 = vmatprep.subr.bf16.mxu1 %v878_v0  ;;  %v715_v12 = vld [vmem:[#allocation8 + $0x20] sm:$0xff]   ;;  %v709_v13 = vld [vmem:[#allocation5 + $0x38] sm:$0xff]   ;;  %v716_v15 = vld [vmem:[#allocation8 + $0x28] sm:$0xff]   ;;  %v363_v1 = vsub.s32 0, %v1038_v63  ;;  %v539_v62 = vsub.s32 1, %v1038_v63 }
  0x5e   :  { %v710_v14 = vld [vmem:[#allocation2] sm:$0xff]   ;;  %v718_v17 = vld [vmem:[#allocation8 + $0x38] sm:$0xff]   ;;  %v719_v29 = vld [vmem:[#allocation10] sm:$0xff]  }
  0x5f   :  { %v717_v16 = vld [vmem:[#allocation8 + $0x30] sm:$0xff]   ;;  %v574_v18 = vld [vmem:[#allocation7] ss:$0 sm:$0xff]  ;;  %v720_v30 = vld [vmem:[#allocation10 + $0x8] sm:$0xff]  }
  0x60   :  { %630 = vmatpush3.bf16.msra.mxu0 %v703_v2  ;;  %650 = vmatpush3.bf16.msra.mxu1 %v712_v6  ;;  %v721_v31 = vld [vmem:[#allocation10 + $0x10] sm:$0xff]   ;;  %v722_v32 = vld [vmem:[#allocation10 + $0x18] sm:$0xff]   ;;  %v723_v33 = vld [vmem:[#allocation10 + $0x20] sm:$0xff]  }
  0x61   :  { %631 = vmatprep.subr.bf16.mxu0 %v878_v0  ;;  %651 = vmatprep.subr.bf16.mxu1 %v878_v0  ;;  %v724_v34 = vld [vmem:[#allocation10 + $0x28] sm:$0xff]   ;;  %v725_v35 = vld [vmem:[#allocation10 + $0x30] sm:$0xff]   ;;  %v726_v36 = vld [vmem:[#allocation10 + $0x38] sm:$0xff]  }
  0x62   :  { %v358_v4 = vld [vmem:[%s1073_s4 + $0x1] sm:$0x1] }
  0x64   :  { %632 = vmatpush3.bf16.msra.mxu0 %v704_v3  ;;  %652 = vmatpush3.bf16.msra.mxu1 %v713_v8 }
  0x65   :  { %633 = vmatprep.subr.bf16.mxu0 %v878_v0  ;;  %653 = vmatprep.subr.bf16.mxu1 %v878_v0 }
  0x68   :  { %634 = vmatpush3.bf16.msra.mxu0 %v705_v5  ;;  %654 = vmatpush3.bf16.msra.mxu1 %v714_v10 }
  0x69   :  { %635 = vmatprep.subr.bf16.mxu0 %v878_v0  ;;  %655 = vmatprep.subr.bf16.mxu1 %v878_v0 }
  0x6c   :  { %636 = vmatpush3.bf16.msra.mxu0 %v706_v7  ;;  %656 = vmatpush3.bf16.msra.mxu1 %v715_v12 }
  0x6d   :  { %637 = vmatprep.subr.bf16.mxu0 %v878_v0  ;;  %657 = vmatprep.subr.bf16.mxu1 %v878_v0 }
  0x70   :  { %638 = vmatpush3.bf16.msra.mxu0 %v707_v9  ;;  %658 = vmatpush3.bf16.msra.mxu1 %v716_v15 }
  0x71   :  { %639 = vmatprep.subr.bf16.mxu0 %v878_v0  ;;  %659 = vmatprep.subr.bf16.mxu1 %v878_v0 }
  0x74   :  { %640 = vmatpush3.bf16.msra.mxu0 %v708_v11  ;;  %660 = vmatpush3.bf16.msra.mxu1 %v717_v16 }
  0x75   :  { %641 = vmatprep.subr.bf16.mxu0 %v878_v0  ;;  %661 = vmatprep.subr.bf16.mxu1 %v878_v0 }
  0x78   :  { %642 = vmatpush3.bf16.msra.mxu0 %v709_v13  ;;  %662 = vmatpush3.bf16.msra.mxu1 %v718_v17 }
  0x79   :  { %667 = vmatprep.subr.bf16.mxu0 %v878_v0 }
  0x7b   :  { %644 = vmatmul.mubr.bf16.vlgmr.msra.gmra.mrb[0].mxu0 %v710_v14 }
  0x7c   :  { %683 = vmatprep.mubr.msk.bf16.mxu0 %vm879_vm0, %v878_v0  ;;  %668 = vmatpush3.bf16.msra.mxu0 %v719_v29 }
  0x7d   :  { %669 = vmatprep.subr.bf16.mxu0 %v878_v0 }
  0x80   :  { %670 = vmatpush3.bf16.msra.mxu0 %v720_v30 }
  0x81   :  { %671 = vmatprep.subr.bf16.mxu0 %v878_v0 }
  0x84   :  { %672 = vmatpush3.bf16.msra.mxu0 %v721_v31 }
  0x85   :  { %673 = vmatprep.subr.bf16.mxu0 %v878_v0 }
  0x88   :  { %674 = vmatpush3.bf16.msra.mxu0 %v722_v32 }
  0x89   :  { %675 = vmatprep.subr.bf16.mxu0 %v878_v0 }
  0x8c   :  { %676 = vmatpush3.bf16.msra.mxu0 %v723_v33 }
  0x8d   :  { %677 = vmatprep.subr.bf16.mxu0 %v878_v0 }
  0x90   :  { %678 = vmatpush3.bf16.msra.mxu0 %v724_v34 }
  0x91   :  { %679 = vmatprep.subr.bf16.mxu0 %v878_v0 }
  0x94   :  { %680 = vmatpush3.bf16.msra.mxu0 %v725_v35 }
  0x95   :  { %681 = vmatprep.subr.bf16.mxu0 %v878_v0  ;;  %v354_v0 = vld [vmem:[%s1073_s4] sm:$0x1] }
  0x98   :  { %682 = vmatpush3.bf16.msra.mxu0 %v726_v36 }
 0x14e   :  { %v217_v19 = vpop.f32.mrb[0].mxu0 }
 0x14f   :  { %v645_v20 = vpop.f32.mrb[1].mxu0  ;;  %v218_v22 = vadd.f32 %v574_v18, %v217_v19 }
 0x150   :  { %v220_v21 = vpop.f32.mrb[2].mxu0 }
 0x151   :  { %v221_v23 = vadd.f32 %v574_v18, %v220_v21  ;;  %v646_v24 = vpop.f32.mrb[3].mxu0  ;;  %v224_v26 = vmax.f32 %v218_v22, 0.0 }
 0x153   :  { %v225_v25 = vmax.f32 %v221_v23, 0.0 }
 0x155   :  { %v227_v27 = vmul.f32 0.0, %v225_v25 }
 0x157   :  { %v228_v28 = vpack.c.bf16 %v227_v27, %v224_v26 }
 0x159   :  { %664 = vmatmul.mubr.bf16.vlgmr.msra.gmra.mrb[0].mxu1 %v228_v28 }
 0x22c   :  { %v327_v37 = vpop.f32.mrb[0].mxu1 }
 0x22d   :  { %v665_v38 = vpop.f32.mrb[1].mxu1  ;;  %v342_v40 = vmul.f32 %v327_v37, %v327_v37 }
 0x22e   :  { %v330_v39 = vpop.f32.mrb[2].mxu1 }
 0x22f   :  { %v334_v41 = vadd.f32 %v330_v39, %v327_v37  ;;  %v343_v42 = vmul.f32 %v330_v39, %v330_v39  ;;  %v666_v43 = vpop.f32.mrb[3].mxu1 }
 0x231   :  { %v335_v44 = vrot.slane %v334_v41, 4  ;;  %v344_v45 = vadd.f32 %v343_v42, %v342_v40  ;;  %v503_v42 = vld [vmem:[%s1075_s6] sm:$0x1] }
 0x233   :  { %v336_v46 = vadd.f32 %v335_v44, %v334_v41  ;;  %v345_v47 = vrot.slane %v344_v45, 4 }
 0x235   :  { %v337_v48 = vrot.slane %v336_v46, 2  ;;  %v346_v49 = vadd.f32 %v345_v47, %v344_v45  ;;  %v507_v45 = vld [vmem:[%s1075_s6 + $0x1] sm:$0x1]  ;;  %s881_s6 = smov [#allocation11]  }
 0x237   :  { %v338_v50 = vadd.f32 %v337_v48, %v336_v46  ;;  %v347_v51 = vrot.slane %v346_v49, 2 }
 0x239   :  { %v339_v52 = vrot.slane %v338_v50, 1  ;;  %v348_v53 = vadd.f32 %v347_v51, %v346_v49  ;;  %v526_v51 = vld [vmem:[%s1076_s7] sm:$0xff]  ;;  %s560_s7 = sshll.u32 %s881_s6, 4  ;;  %s561_s7 = int_to_ptr.vmem [resolvable:$true] %s560_s7 }
 0x23a   :  { %s841_s27 = scalar_lea.vmem %s561_s7, 256  ;;  %p846_p13 = scmp.lt.s32.totalorder %s561_s7, %s561_s7 }
 0x23b   :  { %v340_v54 = vadd.f32 %v339_v52, %v338_v50  ;;  %v349_v55 = vrot.slane %v348_v53, 1  ;;  %p842_p12 = scmp.ne.s32.totalorder %s561_s7, %s841_s27  ;;  %p847_p0 = scmp.lt.s32.totalorder %s841_s27, %s841_s27 }
 0x23d   :  { %v341_v56 = vmul.f32 0.125, %v340_v54  ;;  %v350_v57 = vadd.f32 %v349_v55, %v348_v53  ;;  %v530_v54 = vrot.slane %v526_v51, %v363_v1  ;;  %p848_p1 = por %p847_p0, %p846_p13 }
 0x23f   :  { %v351_v58 = vmul.f32 0.125, %v350_v57  ;;  %v352_v59 = vmul.f32 %v341_v56, %v341_v56  ;;  %p849_p2 = pnand %p848_p1, %p842_p12 }
 0x241   :  { %v353_v60 = vsub.f32 %v351_v58, %v352_v59 }
 0x243   :  { %v355_v61 = vadd.f32 1e-05, %v353_v60 }
 0x245   :  { %727 = vrsqrt.f32 %v355_v61  ;;  %v880_v61 = vmov 0  }
 0x246   :  { %700 = vset.pattern.permute.xlu1 %v880_v61  ;;  %701 = vset.pattern.permute.xlu0 %v880_v61 }
 0x24f   :  { %v728_v2 = vpop.eup %727 }
 0x250   :  { %v357_v3 = vmul.f32 %v728_v2, %v354_v0  ;;  %v540_v0 = vrot.slane %v526_v51, %v539_v62 }
 0x252   :  { %v359_v5 = vmul.f32 %v357_v3, %v341_v56  ;;  %v364_v6 = vrot.slane %v357_v3, %v363_v1 }
 0x254   :  { %v360_v7 = vsub.f32 %v358_v4, %v359_v5  ;;  %v365_v8 = vmul.f32 %v364_v6, %v327_v37  ;;  %v366_v9 = vmul.f32 %v364_v6, %v330_v39 }
 0x256   :  { %v370_v10 = vrot.slane %v360_v7, %v363_v1 }
 0x258   :  { %v371_v11 = vadd.f32 %v370_v10, %v365_v8  ;;  %v372_v12 = vadd.f32 %v370_v10, %v366_v9 }
 0x25a   :  { %v374_v13 = vmax.f32 %v372_v12, 0.0  ;;  %v373_v15 = vmax.f32 %v371_v11, 0.0 }
 0x25c   :  { %v376_v14 = vmul.f32 0.0, %v374_v13 }
 0x25e   :  { %v377_v16 = vpack.c.bf16 %v376_v14, %v373_v15 }
 0x260   :  { %684 = vmatmul.mubr.bf16.vlgmr.msra.gmra.mrb[4].mxu0 %v377_v16 }
 0x333   :  { %v476_v17 = vpop.f32.mrb[4].mxu0 }
 0x334   :  { %v685_v18 = vpop.f32.mrb[5].mxu0  ;;  %v491_v20 = vmul.f32 %v476_v17, %v476_v17 }
 0x335   :  { %v479_v19 = vpop.f32.mrb[6].mxu0 }
 0x336   :  { %v483_v21 = vadd.f32 %v479_v19, %v476_v17  ;;  %v492_v22 = vmul.f32 %v479_v19, %v479_v19  ;;  %v686_v23 = vpop.f32.mrb[7].mxu0 }
 0x338   :  { %v484_v24 = vrot.slane %v483_v21, 4  ;;  %v493_v25 = vadd.f32 %v492_v22, %v491_v20 }
 0x33a   :  { %v485_v26 = vadd.f32 %v484_v24, %v483_v21  ;;  %v494_v27 = vrot.slane %v493_v25, 4 }
 0x33c   :  { %v486_v28 = vrot.slane %v485_v26, 2  ;;  %v495_v29 = vadd.f32 %v494_v27, %v493_v25 }
 0x33e   :  { %v487_v30 = vadd.f32 %v486_v28, %v485_v26  ;;  %v496_v31 = vrot.slane %v495_v29, 2 }
 0x340   :  { %v488_v32 = vrot.slane %v487_v30, 1  ;;  %v497_v33 = vadd.f32 %v496_v31, %v495_v29 }
 0x342   :  { %v489_v34 = vadd.f32 %v488_v32, %v487_v30  ;;  %v498_v35 = vrot.slane %v497_v33, 1 }
 0x344   :  { %v490_v36 = vmul.f32 0.125, %v489_v34  ;;  %v499_v37 = vadd.f32 %v498_v35, %v497_v33 }
 0x346   :  { %v500_v38 = vmul.f32 0.125, %v499_v37  ;;  %v501_v39 = vmul.f32 %v490_v36, %v490_v36 }
 0x348   :  { %v502_v40 = vsub.f32 %v500_v38, %v501_v39 }
 0x34a   :  { %v504_v41 = vadd.f32 1e-05, %v502_v40 }
 0x34c   :  { %729 = vrsqrt.f32 %v504_v41 }
 0x356   :  { %v730_v43 = vpop.eup %729 }
 0x357   :  { %v506_v44 = vmul.f32 %v730_v43, %v503_v42 }
 0x359   :  { %v513_v46 = vrot.slane %v506_v44, %v363_v1  ;;  %v508_v47 = vmul.f32 %v506_v44, %v490_v36 }
 0x35b   :  { %v515_v48 = vmul.f32 %v513_v46, %v479_v19  ;;  %v509_v49 = vsub.f32 %v507_v45, %v508_v47  ;;  %v514_v50 = vmul.f32 %v513_v46, %v476_v17 }
 0x35d   :  { %v519_v52 = vrot.slane %v509_v49, %v363_v1 }
 0x35f   :  { %v520_v53 = vadd.f32 %v519_v52, %v514_v50  ;;  %v521_v55 = vadd.f32 %v519_v52, %v515_v48 }
 0x361   :  { %v522_v56 = vmax.f32 %v520_v53, 0.0  ;;  %v523_v57 = vmax.f32 %v521_v55, 0.0 }
 0x363   :  { %v531_v58 = vmul.f32 %v530_v54, %v522_v56  ;;  %v525_v59 = vmul.f32 0.0, %v523_v57 }
 0x365   :  { %533 = vadd.xlane.f32.xlu0 %v531_v58  ;;  %v532_v60 = vmul.f32 %v530_v54, %v525_v59 }
 0x369   :  { %535 = vadd.xlane.f32.xlu0 %v532_v60 }
 0x3f2   :  { %v534_v2 = vpop.xlane.xlu0 %533 }
 0x3f3   :  { %v541_v3 = vadd.f32 %v540_v0, %v534_v2 }
 0x3f5   :  { %545 = vperm.xlu1 %700, %v541_v3  }
 0x3f6   :  { %v536_v4 = vpop.xlane.xlu0 %535 }
 0x3f7   :  { %v542_v5 = vadd.f32 %v540_v0, %v536_v4 }
 0x3f9   :  { %550 = vperm.xlu1 %700, %v542_v5  }
 0x474   :  { %v546_v1 = vpop.permute.xlu1 %545 }
 0x475   :  { %553 = vst [vmem:[#allocation11] sm:$0xff] %v546_v1 }
 0x478   :  { %v551_v6 = vpop.permute.xlu1 %550 }
 0x479   :  { %554 = vst [vmem:[#allocation11 + $0x8] sm:$0xff] %v551_v6 }
 0x47a   :  { %852 = shalt.err (!%p849_p2)
}
 0x47b   :  { %s853_s28 = scalar_lea.hbm %s1077_s8, 256 }
 0x47c   :  { %p854_p3 = scmp.ne.s32.totalorder %s1077_s8, %s853_s28  ;;  %p857_p4 = scmp.lt.u32.totalorder %s853_s28, %s1077_s8 }
 0x47e   :  { %p859_p5 = pnand %p857_p4, %p854_p3 }
 0x480   :  { %862 = shalt.err (!%p859_p5)
}
 0x481   :  { %s882_s13 = smov 128   ;;  %s883_s14 = smov 8  }
 0x482   :  { %566 = dma.vmem_to_hbm [thread:$0]  %s561_s7, 256, %s1077_s8, [#allocation4], %s882_s13, %s882_s13, %s883_s14  }
 0x483   :  { %869 = dma.done.wait [#allocation4], 256  }
 0x484   :  { %870 = vsyncadd [#allocation4], 4294967040 }
 0x485   :  { %570 = vsyncpa [#allocation3], 1 }
 0x486   :  { %571 = vsyncpa [#allocation6], 1 }
 0x487   :  { %572 = vsyncpa [#allocation9], 1 }
 0x488   :  { %573 = vsyncpa [#allocation4], 1 }

</bundles_post_ra>
